<compile_context>
chip_gen: v7x
topology: tpu7x:2x2x1
jax: 0.10.0
libtpu: 0.0.40
codegen_flags: <defaults>
</compile_context>

<pallas_src>
import functools

import jax
import jax.numpy as jnp
from jax import lax
from jax.experimental import pallas as pl
from jax.experimental.pallas import tpu as pltpu


def _round_up(x, m):
    return ((x + m - 1) // m) * m


# Double-buffered (Mp, tk) feature-tile VMEM budget (bytes).  Conservative for
# v7x (64 MiB physical / 32 MiB default-scoped VMEM); v5e/v6e have headroom.
_FEAT_TILE_BUDGET = 16 * 1024 * 1024
_MAX_TK = 8192
_MIN_GRID_STEPS = 8       # keep the K pipeline deep enough to overlap DMA/MXU
_TK_FLOOR = 512           # >=512 lanes/step already sits near the HBM roofline


def _sublane_pack(dtype):
    # 8 rows for 4-byte dtypes, 16 for 2-byte, 32 for 1-byte (vreg packing).
    return 8 * max(1, 4 // jnp.dtype(dtype).itemsize)


def _choose_k_tiling(K, Mp, itemsize):
    """Pad K only to a lane multiple (128); pick tk that (a) divides Kp,
    (b) keeps >= ~_MIN_GRID_STEPS pipeline steps, (c) fits the VMEM budget."""
    Kp = _round_up(max(K, 1), 128)
    budget_tk = (_FEAT_TILE_BUDGET // (2 * Mp * itemsize)) // 128 * 128
    steps_tk = max(_TK_FLOOR, (Kp // _MIN_GRID_STEPS) // 128 * 128)
    target = max(128, min(_MAX_TK, budget_tk, steps_tk, Kp))
    n = Kp // 128
    best = 1
    for d in range(1, n + 1):
        if n % d == 0 and d * 128 <= target:
            best = d
    return Kp, best * 128


def _vmem_limit_bytes(Mp, tk, itemsize, n_resident_mm):
    need = (2 * Mp * tk * itemsize          # double-buffered feature tiles
            + n_resident_mm * Mp * Mp * 4   # resident f32 gram-sized buffers
            + (2 << 20))                    # slack for Mosaic internals
    return int(min(max(need * 5 // 4, 16 << 20), 100 << 20))


# ---------------------------------------------------------------------------
# Kernels
# ---------------------------------------------------------------------------

def _gram_kernel(feat_ref, g_ref, *, inv_gram_norm):
    """Gram-only kernel (target precompute path): accumulate into the output."""
    k = pl.program_id(0)

    @pl.when(k == 0)
    def _init():
        g_ref[...] = jnp.zeros_like(g_ref)

    f = feat_ref[...]
    # Contract the last dim of BOTH operands: f @ f.T with no XLU transpose.
    g_ref[...] += lax.dot_general(
        f, f, dimension_numbers=(((1,), (1,)), ((), ())),
        preferred_element_type=jnp.float32)

    @pl.when(k == pl.num_programs(0) - 1)
    def _finalize():
        g_ref[...] = g_ref[...] * inv_gram_norm


def _loss_kernel(feat_ref, tgt_hbm, loss_ref, acc_ref, tgt_vmem, tgt_sem, *,
                 inv_gram_norm, inv_n_g):
    """Loss kernel: gram accumulates in a VMEM f32 scratch; the target gram is
    DMA'd from HBM once (started at step 0, waited at the last step); only the
    scalar loss leaves the kernel."""
    k = pl.program_id(0)

    @pl.when(k == 0)
    def _init():
        acc_ref[...] = jnp.zeros_like(acc_ref)
        pltpu.make_async_copy(tgt_hbm, tgt_vmem, tgt_sem).start()

    f = feat_ref[...]
    acc_ref[...] += lax.dot_general(
        f, f, dimension_numbers=(((1,), (1,)), ((), ())),
        preferred_element_type=jnp.float32)

    @pl.when(k == pl.num_programs(0) - 1)
    def _finalize():
        pltpu.make_async_copy(tgt_hbm, tgt_vmem, tgt_sem).wait()
        g = acc_ref[...] * inv_gram_norm
        diff = g - tgt_vmem[...]
        loss_ref[0, 0] = jnp.sum(diff * diff) * inv_n_g


# ---------------------------------------------------------------------------
# pallas_call builders
# ---------------------------------------------------------------------------

@functools.lru_cache(maxsize=None)
def _build_gram_call(M, K, Mp, Kp, tk, feat_dtype_name):
    itemsize = jnp.dtype(feat_dtype_name).itemsize
    kernel = functools.partial(_gram_kernel, inv_gram_norm=1.0 / float(M * K))
    return pl.pallas_call(
        kernel,
        out_shape=jax.ShapeDtypeStruct((Mp, Mp), jnp.float32),
        grid_spec=pltpu.PrefetchScalarGridSpec(
            num_scalar_prefetch=0,
            grid=(Kp // tk,),
            in_specs=[pl.BlockSpec((Mp, tk), lambda k: (0, k))],   # features
            out_specs=pl.BlockSpec((Mp, Mp), lambda k: (0, 0)),    # resident gram
        ),
        compiler_params=pltpu.CompilerParams(
            dimension_semantics=("arbitrary",),
            vmem_limit_bytes=_vmem_limit_bytes(Mp, tk, itemsize, 2),
        ),
        cost_estimate=pl.CostEstimate(
            flops=2 * M * M * K,
            transcendentals=0,
            bytes_accessed=M * K * itemsize + M * M * 4),
    )


@functools.lru_cache(maxsize=None)
def _build_loss_call(M, K, Mp, Kp, tk, feat_dtype_name):
    itemsize = jnp.dtype(feat_dtype_name).itemsize
    kernel = functools.partial(
        _loss_kernel,
        inv_gram_norm=1.0 / float(M * K),   # a*b*c*d (original, unpadded)
        inv_n_g=1.0 / float(M * M),         # mean over the original M x M gram
    )
    return pl.pallas_call(
        kernel,
        out_shape=jax.ShapeDtypeStruct((1, 1), jnp.float32),
        grid_spec=pltpu.PrefetchScalarGridSpec(
            num_scalar_prefetch=0,
            grid=(Kp // tk,),
            in_specs=[
                pl.BlockSpec((Mp, tk), lambda k: (0, k)),   # features (streamed)
                pl.BlockSpec(memory_space=pl.ANY),          # target gram (in HBM)
            ],
            out_specs=pl.BlockSpec(memory_space=pltpu.SMEM),  # scalar loss
            scratch_shapes=[
                pltpu.VMEM((Mp, Mp), jnp.float32),   # gram accumulator
                pltpu.VMEM((Mp, Mp), jnp.float32),   # target landing buffer
                pltpu.SemaphoreType.DMA,             # target copy completion
            ],
        ),
        compiler_params=pltpu.CompilerParams(
            dimension_semantics=("arbitrary",),
            vmem_limit_bytes=_vmem_limit_bytes(Mp, tk, itemsize, 2),
        ),
        cost_estimate=pl.CostEstimate(
            flops=2 * M * M * K,
            transcendentals=0,
            bytes_accessed=M * K * itemsize + 2 * M * M * 4),
    )


# ---------------------------------------------------------------------------
# Wrappers (jitted so reshape / pad / optional cast fuse into one pass)
# ---------------------------------------------------------------------------

def _prep_features(x_nchw, feat_dtype_name):
    n, c, h, w = x_nchw.shape
    M, K = n * c, h * w
    dt = jnp.dtype(feat_dtype_name)
    Mp = _round_up(M, _sublane_pack(dt))
    Kp, tk = _choose_k_tiling(K, Mp, dt.itemsize)
    f = x_nchw.reshape(M, K).astype(dt)
    if (Mp, Kp) != (M, K):
        f = jnp.pad(f, ((0, Mp - M), (0, Kp - K)))
    return f, (M, K, Mp, Kp, tk)


@functools.partial(jax.jit, static_argnames=("feat_dtype_name",))
def _gram_padded_jit(x_nchw, feat_dtype_name):
    feat, (M, K, Mp, Kp, tk) = _prep_features(x_nchw, feat_dtype_name)
    return _build_gram_call(M, K, Mp, Kp, tk, feat_dtype_name)(feat)


@functools.partial(jax.jit, static_argnames=("feat_dtype_name",))
def _style_loss_jit(x_nchw, target_padded, feat_dtype_name):
    feat, (M, K, Mp, Kp, tk) = _prep_features(x_nchw, feat_dtype_name)
    loss = _build_loss_call(M, K, Mp, Kp, tk, feat_dtype_name)(feat, target_padded)
    return loss[0, 0]


def gram_matrix(x_nchw, feature_dtype=None):
    """gram_matrix(input) from the PyTorch reference, computed by the Pallas kernel."""
    dt = jnp.dtype(feature_dtype) if feature_dtype is not None else jnp.dtype(x_nchw.dtype)
    n, c, _, _ = x_nchw.shape
    M = n * c
    g = _gram_padded_jit(x_nchw, dt.name)
    return g[:M, :M]


class StyleLoss:
    """JAX/Pallas port of the PyTorch StyleLoss module.

    __call__(x) returns x unchanged and stashes the scalar MSE loss between
    gram_matrix(x) and the precomputed (detached) target gram in self.loss.

    By default features stream in the producer's dtype (no extra cast/copy
    pass through HBM).  Pass feature_dtype=jnp.bfloat16 only if the upstream
    layer already emits bf16 (f32 accumulation on the MXU either way).
    """

    def __init__(self, target_feature, feature_dtype=None):
        self._feat_dtype = (jnp.dtype(feature_dtype) if feature_dtype is not None
                            else jnp.dtype(target_feature.dtype))
        n, c, _, _ = target_feature.shape
        self._M = n * c
        self._target_padded = _gram_padded_jit(target_feature, self._feat_dtype.name)
        self.target = self._target_padded[:self._M, :self._M]   # matches PyTorch
        self.loss = None

    def __call__(self, x_nchw):
        n, c, _, _ = x_nchw.shape
        assert n * c == self._M, "input N*C must match the target feature's N*C"
        self.loss = _style_loss_jit(x_nchw, self._target_padded, self._feat_dtype.name)
        return x_nchw  # forward() returns the input unchanged


# ---------------------------------------------------------------------------
# Pure-JAX reference + self-test
# ---------------------------------------------------------------------------

def _reference_gram(t):
    a, b, c, d = t.shape
    f = t.reshape(a * b, c * d).astype(jnp.float32)
    return (f @ f.T) / (a * b * c * d)


def _reference_loss(x, target_feature):
    return jnp.mean((_reference_gram(x) - _reference_gram(target_feature)) ** 2)


if __name__ == "__main__":
    key = jax.random.PRNGKey(0)
    k1, k2, k3, k4 = jax.random.split(key, 4)

    # Small NCHW shapes consistent with the module: batch=2, channels=4, 16x16.
    target_feature = jax.random.normal(k1, (2, 4, 16, 16), dtype=jnp.float32)
    x = jax.random.normal(k2, (2, 4, 16, 16), dtype=jnp.float32)

    ref_gram = jax.block_until_ready(_reference_gram(x))
    ref_loss = jax.block_until_ready(_reference_loss(x, target_feature))

    # Gram path (f32 streaming): tight check against the pure-JAX reference.
    g = jax.block_until_ready(gram_matrix(x))
    assert g.shape == ref_gram.shape
    assert jnp.allclose(g, ref_gram, rtol=1e-5, atol=1e-6)

    # Default StyleLoss path (streams the producer dtype, here f32).
    style = StyleLoss(target_feature)
    out = style(x)
    loss = jax.block_until_ready(style.loss)
    assert out.shape == x.shape and jnp.allclose(out, x)
    assert jnp.allclose(loss, ref_loss, rtol=1e-5, atol=1e-6), (loss, ref_loss)

    # Multi-step K grid (exercises the resident accumulator + target prefetch).
    t2 = jax.random.normal(k3, (1, 8, 32, 64), dtype=jnp.float32)   # K=2048 -> 4 steps
    x2 = jax.random.normal(k4, (1, 8, 32, 64), dtype=jnp.float32)
    s2 = StyleLoss(t2)
    s2(x2)
    l2 = jax.block_until_ready(s2.loss)
    assert jnp.allclose(l2, _reference_loss(x2, t2), rtol=1e-5, atol=1e-6)

    # Non-aligned M and K (exercises sublane/lane zero padding).
    t3 = jax.random.normal(k1, (1, 3, 10, 10), dtype=jnp.float32)
    x3 = jax.random.normal(k2, (1, 3, 10, 10), dtype=jnp.float32)
    s3 = StyleLoss(t3)
    s3(x3)
    l3 = jax.block_until_ready(s3.loss)
    assert jnp.allclose(l3, _reference_loss(x3, t3), rtol=1e-5, atol=1e-6)

    # Opt-in bf16 streaming (f32 accumulation): looser tolerance vs f32 ref.
    s_bf16 = StyleLoss(target_feature, feature_dtype=jnp.bfloat16)
    s_bf16(x)
    l_bf16 = jax.block_until_ready(s_bf16.loss)
    assert jnp.allclose(l_bf16, ref_loss, rtol=1e-1, atol=2e-5), (l_bf16, ref_loss)

    print("KERNEL_OK")
</pallas_src>

<mosaic_0001>
module attributes {stable_mosaic.version = 11 : i64} {
  func.func @_gram_kernel(%arg0: i32, %arg1: memref<8x256xf32, #tpu.memory_space<vmem>>, %arg2: memref<8x8xf32, #tpu.memory_space<vmem>>) attributes {dimension_semantics = [#tpu.dimension_semantics<arbitrary>], iteration_bounds = array<i64: 1>, scalar_prefetch = 0 : i64, scratch_operands = 0 : i64, tpu.core_type = #tpu.core_type<tc>, window_params = [{transform_indices = @transform_0, window_bounds = array<i64: 8, 256>}, {pipeline_mode = #tpu.pipeline_mode<synchronous>, transform_indices = @transform_1, window_bounds = array<i64: 8, 8>}]} {
    %c0_i32 = arith.constant 0 : i32
    %0 = arith.cmpi eq, %arg0, %c0_i32 : i32
    %1 = arith.extui %0 : i1 to i32
    %c0_i32_0 = arith.constant 0 : i32
    %2 = arith.cmpi ne, %1, %c0_i32_0 : i32
    scf.if %2 {
      %cst_8 = arith.constant 0.000000e+00 : f32
      %11 = vector.broadcast %cst_8 : f32 to vector<8x8xf32>
      %c0_9 = arith.constant 0 : index
      %c0_10 = arith.constant 0 : index
      %12 = vector.load %arg2[%c0_9, %c0_10] : memref<8x8xf32, #tpu.memory_space<vmem>>, vector<8x8xf32>
      tpu.vector_store %arg2[%c0_9, %c0_10], %11 {strides = array<i32>} : memref<8x8xf32, #tpu.memory_space<vmem>>, vector<8x8xf32>,
    } else {
    }
    %c0 = arith.constant 0 : index
    %c0_1 = arith.constant 0 : index
    %3 = vector.load %arg1[%c0, %c0_1] : memref<8x256xf32, #tpu.memory_space<vmem>>, vector<8x256xf32>
    %c0_2 = arith.constant 0 : index
    %c0_3 = arith.constant 0 : index
    %4 = vector.load %arg2[%c0_2, %c0_3] : memref<8x8xf32, #tpu.memory_space<vmem>>, vector<8x8xf32>
    %cst = arith.constant dense<0.000000e+00> : vector<8x8xf32>
    %5 = tpu.matmul %3, %3, %cst {dimension_numbers = #tpu.dot_dimension_numbers<[1], [1], [0], [0], [0, 0, 1, 0], [], []>} : vector<8x256xf32>, vector<8x256xf32>, vector<8x8xf32> -> vector<8x8xf32>
    %6 = arith.addf %4, %5 : vector<8x8xf32>
    %c0_4 = arith.constant 0 : index
    %c0_5 = arith.constant 0 : index
    %7 = vector.load %arg2[%c0_4, %c0_5] : memref<8x8xf32, #tpu.memory_space<vmem>>, vector<8x8xf32>
    tpu.vector_store %arg2[%c0_4, %c0_5], %6 {strides = array<i32>} : memref<8x8xf32, #tpu.memory_space<vmem>>, vector<8x8xf32>,
    %c0_i32_6 = arith.constant 0 : i32
    %8 = arith.cmpi eq, %arg0, %c0_i32_6 : i32
    %9 = arith.extui %8 : i1 to i32
    %c0_i32_7 = arith.constant 0 : i32
    %10 = arith.cmpi ne, %9, %c0_i32_7 : i32
    scf.if %10 {
      %c0_8 = arith.constant 0 : index
      %c0_9 = arith.constant 0 : index
      %11 = vector.load %arg2[%c0_8, %c0_9] : memref<8x8xf32, #tpu.memory_space<vmem>>, vector<8x8xf32>
      %cst_10 = arith.constant 4.8828125E-4 : f32
      %12 = vector.broadcast %cst_10 : f32 to vector<8x8xf32>
      %13 = arith.mulf %11, %12 : vector<8x8xf32>
      %c0_11 = arith.constant 0 : index
      %c0_12 = arith.constant 0 : index
      %14 = vector.load %arg2[%c0_11, %c0_12] : memref<8x8xf32, #tpu.memory_space<vmem>>, vector<8x8xf32>
      tpu.vector_store %arg2[%c0_11, %c0_12], %13 {strides = array<i32>} : memref<8x8xf32, #tpu.memory_space<vmem>>, vector<8x8xf32>,
    } else {
    }
    return
  }
  func.func @transform_0(%arg0: i32) -> (i32, i32) {
    %c0_i32 = arith.constant 0 : i32
    %c0_i32_0 = arith.constant 0 : i32
    return %c0_i32, %arg0 : i32, i32
  }
  func.func @transform_1(%arg0: i32) -> (i32, i32) {
    %c0_i32 = arith.constant 0 : i32
    %c0_i32_0 = arith.constant 0 : i32
    %c0_i32_1 = arith.constant 0 : i32
    return %c0_i32, %c0_i32_0 : i32, i32
  }
}

</mosaic_0001>

<bundles_post_ra>
// kernel: _gram_padded_jit.1
= control target key start
LH: loop header
LB: loop body
LE: loop exit
PB: predicated region body
PF: predicated region fallthrough
CT: control target
= control target key end

     0   :  { %vm13_vm0 = vcmask 64512   ;;  %s170_s0 = inlined_call_operand.vmem [shape: f32[8,256], index: 0, kind: input, shape index: {}]   ;;  %s171_s1 = inlined_call_operand.hbm [shape: f32[8,8], index: 1, kind: output, shape index: {}]  }
   0x1   :  { %v16_v0 = vld [vmem:[%s170_s0 + $0x8] sm:$0xff]  ;;  %v15_v1 = vld [vmem:[%s170_s0] sm:$0xff] }
   0x2   :  { %6 = vsyncpa [#allocation3], 0  ;;  %18 = vmatprep.subr.mxu0 %v16_v0  ;;  %82 = vmatprep.mubr.f32.mxu0 %v16_v0  ;;  %v137_v2 = vmov 0.0   ;;  %s138_s10 = smov [#allocation2]  }
   0x3   :  { %14 = vst.msk [vmem:[#allocation2] sm:$0xff] %vm13_vm0, %v137_v2  ;;  %19 = vmatpush1.xpose.msra.mxu0 %v15_v1  ;;  %s103_s11 = sshll.u32 %s138_s10, 4  ;;  %s104_s11 = int_to_ptr.vmem [resolvable:$true] %s103_s11 }
   0x4   :  { %s113_s0 = scalar_lea.vmem %s104_s11, 128  ;;  %p118_p1 = scmp.lt.s32.totalorder %s104_s11, %s104_s11 }
   0x5   :  { %p114_p0 = scmp.ne.s32.totalorder %s104_s11, %s113_s0  ;;  %p119_p2 = scmp.lt.s32.totalorder %s113_s0, %s113_s0 }
   0x6   :  { %83 = vmatmul.mubr.f32.vlgmr.msra.gmra.mrb[0].mxu0 %v15_v1 }
   0x7   :  { %p120_p3 = por %p119_p2, %p118_p1 }
   0x9   :  { %p121_p4 = pnand %p120_p3, %p114_p0 }
   0xa   :  { %v17_v3 = vld [vmem:[#allocation2] sm:$0xff] }
  0xd9   :  { %v84_v4 = vpop.f32.mrb[0].mxu0 }
  0xda   :  { %v88_v5 = vadd.f32 %v84_v4, %v17_v3  ;;  %v86_v6 = vpop.f32.mrb[1].mxu0 }
  0xdc   :  { %90 = vst.msk [vmem:[#allocation2] sm:$0xff] %vm13_vm0, %v88_v5 }
  0xe3   :  { %v94_v7 = vld [vmem:[#allocation2] sm:$0xff] }
  0xe4   :  { %v95_v8 = vmul.f32 0.00048828125, %v94_v7 }
  0xe6   :  { %96 = vst.msk [vmem:[#allocation2] sm:$0xff] %vm13_vm0, %v95_v8 }
  0xe7   :  { %124 = shalt.err (!%p121_p4)
}
  0xe8   :  { %s125_s14 = scalar_lea.hbm %s171_s1, 128 }
  0xe9   :  { %p126_p5 = scmp.ne.s32.totalorder %s171_s1, %s125_s14  ;;  %p129_p6 = scmp.lt.u32.totalorder %s125_s14, %s171_s1 }
  0xeb   :  { %p131_p7 = pnand %p129_p6, %p126_p5 }
  0xed   :  { %134 = shalt.err (!%p131_p7)
}
  0xee   :  { %106 = dma.vmem_to_hbm [thread:$0]  %s104_s11, 128, %s171_s1, [#allocation3]  }
  0xef   :  { %135 = dma.done.wait [#allocation3], 128  }
  0xf0   :  { %136 = vsyncadd [#allocation3], 4294967168 }
  0xf1   :  { %110 = vsyncpa [#allocation3], 1 }

</bundles_post_ra>
